<compile_context>
chip_gen: v7x
topology: tpu7x:2x2x1
jax: 0.10.0
libtpu: 0.0.40
codegen_flags: <defaults>
</compile_context>

<pallas_src>
import jax
import jax.numpy as jnp
from jax.experimental import pallas as pl
from jax.experimental.pallas import tpu as pltpu


def _vap_head_kernel(x_ref, w1_ref, b1_ref, w2_ref, b2_ref, o_ref):
    # x_ref : (B, T, D) f32   activations
    # w1_ref: (T, 1)    f32   one_frame_head weight (transposed layout)
    # b1_ref: (1, 1)    f32   one_frame_head bias (SMEM scalar)
    # w2_ref: (D, C)    bf16  projection_head weight, transposed, stored narrow
    # b2_ref: (1, C)    f32   projection_head bias
    # o_ref : (B, C)    f32   lane-dense output slab
    x = x_ref[...]                              # (B, T, D) f32
    w1 = w1_ref[...]                            # (T, 1)    f32

    # Stage 1 (VPU): weighted reduction over the T (frame) axis, f32 throughout
    # (v5e has no bf16 VPU; explicit f32 avoids any lowering surprise).
    v = jnp.sum(x * w1, axis=1) + b1_ref[0, 0]  # (B, D) f32

    # Stage 2 (MXU): (B, D) @ (D, C) with f32 accumulation. Weight is DMA'd as
    # bf16 and upcast only at the point of use; this kernel is DMA-bound, so the
    # K=32 "small" MXU shape is irrelevant.
    w2 = w2_ref[...].astype(jnp.float32)        # (D, C)
    acc = jnp.dot(v, w2, preferred_element_type=jnp.float32)   # (B, C)
    o_ref[...] = (acc + b2_ref[...]).astype(o_ref.dtype)


def prepare_vap_head_params(w1, b1, w2, b2, weight_dtype=jnp.bfloat16):
    """One-time parameter preprocessing.

    Call this ONCE per model (cache the result as model state); it must not be
    re-traced on every forward call.  w1: (1, T); b1: (1,); w2: (C, D); b2: (C,).
    """
    w1t = jnp.asarray(w1, jnp.float32).reshape(-1, 1)           # (T, 1)
    b1s = jnp.asarray(b1, jnp.float32).reshape(1, 1)            # (1, 1)
    w2t = jnp.transpose(jnp.asarray(w2)).astype(weight_dtype)   # (D, C) bf16 storage
    b2r = jnp.asarray(b2, jnp.float32).reshape(1, -1)           # (1, C)
    return w1t, b1s, w2t, b2r


def vap_head_forward(x, w1t, b1s, w2t, b2r):
    """x: (B, T, D) f32; prepared params from prepare_vap_head_params().

    Returns (B, 1, C), matching the PyTorch module's discrete-head output.
    """
    B, T, D = x.shape
    C = w2t.shape[1]

    w_bytes = int(jnp.dtype(w2t.dtype).itemsize)
    x_bytes = int(jnp.dtype(x.dtype).itemsize)
    cost = pl.CostEstimate(
        flops=2 * B * T * D + 2 * B * D * C,
        transcendentals=0,
        bytes_accessed=(B * T * D * x_bytes        # x
                        + T * 4 + 4                # w1, b1
                        + D * C * w_bytes          # w2 (bf16)
                        + C * 4                    # b2
                        + B * C * 4),              # out
    )

    out = pl.pallas_call(
        _vap_head_kernel,
        out_shape=jax.ShapeDtypeStruct((B, C), jnp.float32),
        in_specs=[
            pl.BlockSpec((B, T, D), lambda: (0, 0, 0)),                 # x (full block)
            pl.BlockSpec((T, 1), lambda: (0, 0)),                       # w1t
            pl.BlockSpec(memory_space=pltpu.MemorySpace.SMEM),          # b1 scalar
            pl.BlockSpec((D, C), lambda: (0, 0)),                       # w2t (bf16)
            pl.BlockSpec((1, C), lambda: (0, 0)),                       # b2
        ],
        out_specs=pl.BlockSpec((B, C), lambda: (0, 0)),
        cost_estimate=cost,
    )(x, w1t, b1s, w2t, b2r)

    # Match the PyTorch module's (B, 1, n_classes) output shape outside the kernel.
    return out.reshape(B, 1, C)


def reference_forward(x, w1, b1, w2, b2):
    # Pure-JAX mirror of the PyTorch module (discrete branch) for verification.
    xt = jnp.swapaxes(x, 1, 2)                                   # (B, D, T)
    v = jnp.einsum("bdt,ot->bdo", xt, w1) + b1                   # (B, D, 1)
    v = jnp.swapaxes(v, 1, 2)                                    # (B, 1, D)
    out = jnp.einsum("btd,cd->btc", v, w2) + b2                  # (B, 1, C)
    return out


if __name__ == "__main__":
    # Config consistent with the module: t_dim = seq length, d_dim = hidden,
    # bin_times of length 4 -> total_bins = 8 -> n_classes = 2**8 = 256.
    B, T, D = 2, 8, 32
    bin_times = [0.2, 0.4, 0.6, 0.8]
    n_classes = 2 ** (2 * len(bin_times))   # 256

    key = jax.random.PRNGKey(0)
    kx, kw1, kb1, kw2, kb2 = jax.random.split(key, 5)

    x = jax.random.normal(kx, (B, T, D), dtype=jnp.float32)
    # one_frame_head: nn.Linear(t_dim, 1)
    w1 = jax.random.normal(kw1, (1, T), dtype=jnp.float32) * 0.1
    b1 = jax.random.normal(kb1, (1,), dtype=jnp.float32) * 0.1
    # projection_head: nn.Linear(d_dim, n_classes)
    w2 = jax.random.normal(kw2, (n_classes, D), dtype=jnp.float32) * 0.1
    b2 = jax.random.normal(kb2, (n_classes,), dtype=jnp.float32) * 0.1

    # One-time param prep (cached as model state; NOT re-done per forward call).
    params = prepare_vap_head_params(w1, b1, w2, b2)

    fwd = jax.jit(vap_head_forward)
    out = jax.block_until_ready(fwd(x, *params))
    assert out.shape == (B, 1, n_classes), out.shape

    # (a) Apples-to-apples check: reference with the same bf16-quantized w2.
    w2_q = w2.astype(jnp.bfloat16).astype(jnp.float32)
    ref_q = reference_forward(x, w1, b1, w2_q, b2)
    assert jnp.allclose(out, ref_q, atol=1e-4, rtol=1e-4), "mismatch vs quantized reference"

    # (b) End-to-end check vs the exact f32 PyTorch semantics; slack covers only
    #     the bf16 storage quantization of w2 (~0.4% relative).
    ref_f32 = reference_forward(x, w1, b1, w2, b2)
    assert jnp.allclose(out, ref_f32, atol=1e-2, rtol=1e-2), "mismatch vs f32 reference"

    # TODO(synk): only the "discrete" head type is implemented; "comparative" and
    # "independent" branches of VAPHead are config variants not exercised here.
    print("KERNEL_OK")
</pallas_src>

<mosaic_0001>
module attributes {stable_mosaic.version = 11 : i64} {
  func.func @_vap_head_kernel(%arg0: memref<2x8x32xf32, #tpu.memory_space<vmem>>, %arg1: memref<8x1xf32, #tpu.memory_space<vmem>>, %arg2: memref<1x1xf32, #tpu.memory_space<smem>>, %arg3: memref<32x256xbf16, #tpu.memory_space<vmem>>, %arg4: memref<1x256xf32, #tpu.memory_space<vmem>>, %arg5: memref<2x256xf32, #tpu.memory_space<vmem>>) attributes {dimension_semantics = [], scalar_prefetch = 0 : i64, scratch_operands = 0 : i64, tpu.core_type = #tpu.core_type<tc>} {
    %c0 = arith.constant 0 : index
    %c0_0 = arith.constant 0 : index
    %c0_1 = arith.constant 0 : index
    %0 = vector.load %arg0[%c0, %c0_0, %c0_1] : memref<2x8x32xf32, #tpu.memory_space<vmem>>, vector<2x8x32xf32>
    %c0_2 = arith.constant 0 : index
    %c0_3 = arith.constant 0 : index
    %1 = vector.load %arg1[%c0_2, %c0_3] : memref<8x1xf32, #tpu.memory_space<vmem>>, vector<8x1xf32>
    %2 = vector.shape_cast %1 : vector<8x1xf32> to vector<1x8x1xf32>
    %3 = vector.broadcast %2 : vector<1x8x1xf32> to vector<2x8x32xf32>
    %4 = arith.mulf %0, %3 : vector<2x8x32xf32>
    %cst = arith.constant dense<0.000000e+00> : vector<2x32xf32>
    %5 = vector.multi_reduction <add>, %4, %cst [1] : vector<2x8x32xf32> to vector<2x32xf32>
    %c0_4 = arith.constant 0 : index
    %c0_5 = arith.constant 0 : index
    %6 = memref.load %arg2[%c0_4, %c0_5] : memref<1x1xf32, #tpu.memory_space<smem>>
    %7 = vector.broadcast %6 : f32 to vector<2x32xf32>
    %8 = arith.addf %5, %7 : vector<2x32xf32>
    %c0_6 = arith.constant 0 : index
    %c0_7 = arith.constant 0 : index
    %9 = vector.load %arg3[%c0_6, %c0_7] : memref<32x256xbf16, #tpu.memory_space<vmem>>, vector<32x256xbf16>
    %10 = arith.extf %9 : vector<32x256xbf16> to vector<32x256xf32>
    %cst_8 = arith.constant dense<0.000000e+00> : vector<2x256xf32>
    %11 = tpu.matmul %8, %10, %cst_8 {dimension_numbers = #tpu.dot_dimension_numbers<[1], [0], [0], [1], [0, 0, 1, 1], [], []>} : vector<2x32xf32>, vector<32x256xf32>, vector<2x256xf32> -> vector<2x256xf32>
    %c0_9 = arith.constant 0 : index
    %c0_10 = arith.constant 0 : index
    %12 = vector.load %arg4[%c0_9, %c0_10] : memref<1x256xf32, #tpu.memory_space<vmem>>, vector<1x256xf32>
    %13 = vector.broadcast %12 : vector<1x256xf32> to vector<2x256xf32>
    %14 = arith.addf %11, %13 : vector<2x256xf32>
    %c0_11 = arith.constant 0 : index
    %c0_12 = arith.constant 0 : index
    %15 = vector.load %arg5[%c0_11, %c0_12] : memref<2x256xf32, #tpu.memory_space<vmem>>, vector<2x256xf32>
    tpu.vector_store %arg5[%c0_11, %c0_12], %14 {strides = array<i32>} : memref<2x256xf32, #tpu.memory_space<vmem>>, vector<2x256xf32>,
    return
  }
}

</mosaic_0001>

<bundles_post_ra>
// kernel: vap_head_forward.1
= control target key start
LH: loop header
LB: loop body
LE: loop exit
PB: predicated region body
PF: predicated region fallthrough
CT: control target
= control target key end

     0   :  { %11 = vsyncpa [#allocation4], 0  ;;  %s347_s0 = inlined_call_operand.hbm [shape: f32[2,8,32], index: 0, kind: input, shape index: {}]   ;;  %s348_s1 = inlined_call_operand.vmem [shape: f32[8,1], index: 1, kind: input, shape index: {}]   ;;  %s349_s2 = inlined_call_operand.<no memory space> [shape: f32[1,1], index: 2, kind: input, shape index: {}]   ;;  %s350_s3 = inlined_call_operand.hbm [shape: bf16[32,256], index: 3, kind: input, shape index: {}]   ;;  %s351_s4 = inlined_call_operand.vmem [shape: f32[1,256], index: 4, kind: input, shape index: {}]   ;;  %s352_s5 = inlined_call_operand.vmem [shape: f32[2,256], index: 5, kind: output, shape index: {}]  }
   0x1   :  { %12 = vsyncpa [#allocation6], 0  ;;  %s272_s18 = smov [#allocation3]   ;;  %s224_s22 = scalar_lea.hbm %s347_s0, 256 }
   0x2   :  { %s18_s19 = sshll.u32 %s272_s18, 4  ;;  %p225_p0 = scmp.ne.s32.totalorder %s347_s0, %s224_s22  ;;  %s19_s19 = int_to_ptr.vmem [resolvable:$true] %s18_s19 }
   0x3   :  { %p228_p1 = scmp.lt.u32.totalorder %s224_s22, %s347_s0 }
   0x5   :  { %p230_p2 = pnand %p228_p1, %p225_p0 }
   0x7   :  { %233 = shalt.err (!%p230_p2)
}
   0x8   :  { %s234_s27 = scalar_lea.vmem %s19_s19, 256  ;;  %p239_p4 = scmp.lt.s32.totalorder %s19_s19, %s19_s19 }
   0x9   :  { %p235_p3 = scmp.ne.s32.totalorder %s19_s19, %s234_s27  ;;  %p240_p5 = scmp.lt.s32.totalorder %s234_s27, %s234_s27 }
   0xb   :  { %p241_p6 = por %p240_p5, %p239_p4 }
   0xd   :  { %p242_p7 = pnand %p241_p6, %p235_p3 }
   0xf   :  { %245 = shalt.err (!%p242_p7)
}
  0x10   :  { %s273_s28 = smov 128   ;;  %s274_s29 = smov 8  }
  0x11   :  { %24 = dma.hbm_to_vmem [thread:$0]  %s347_s0, 256, %s19_s19, [#allocation4], %s273_s28, %s273_s28, %s274_s29  }
  0x12   :  { %s275_s7 = smov [#allocation5]   ;;  %s246_s11 = scalar_lea.hbm %s350_s3, 512 }
  0x13   :  { %s34_s8 = sshll.u32 %s275_s7, 4  ;;  %p247_p8 = scmp.ne.s32.totalorder %s350_s3, %s246_s11  ;;  %s35_s8 = int_to_ptr.vmem [resolvable:$true] %s34_s8 }
  0x14   :  { %p250_p9 = scmp.lt.u32.totalorder %s246_s11, %s350_s3 }
  0x16   :  { %p252_p10 = pnand %p250_p9, %p247_p8 }
  0x18   :  { %255 = shalt.err (!%p252_p10)
}
  0x19   :  { %s256_s16 = scalar_lea.vmem %s35_s8, 512  ;;  %p261_p12 = scmp.lt.s32.totalorder %s35_s8, %s35_s8 }
  0x1a   :  { %p257_p11 = scmp.ne.s32.totalorder %s35_s8, %s256_s16  ;;  %p262_p13 = scmp.lt.s32.totalorder %s256_s16, %s256_s16 }
  0x1c   :  { %p263_p0 = por %p262_p13, %p261_p12 }
  0x1e   :  { %p264_p1 = pnand %p263_p0, %p257_p11 }
  0x20   :  { %267 = shalt.err (!%p264_p1)
}
  0x21   :  { %40 = dma.hbm_to_vmem [thread:$0]  %s350_s3, 512, %s35_s8, [#allocation6], %s273_s28, %s273_s28, %s274_s29  }
  0x22   :  { %268 = dma.done.wait [#allocation4], 256  }
  0x23   :  { %269 = vsyncadd [#allocation4], 4294967040 }
  0x24   :  { %270 = dma.done.wait [#allocation6], 512  }
  0x25   :  { %271 = vsyncadd [#allocation6], 4294966784  ;;  %v276_v0 = vmov 0   ;;  %v51_v1 = vld [vmem:[%s348_s1] sm:$0xff]  ;;  %v218_v2 = vld [vmem:[#allocation5 + $0x4] ss:$8 sps:$4 sm:$0xff]   ;;  %v75_v24 = vstv %s349_s2  ;;  %v92_v30 = vlaneseq }
  0x26   :  { %217 = vset.pattern.permute.xlu0 %v276_v0  ;;  %v220_v3 = vld [vmem:[#allocation5] ss:$8 sps:$4 sm:$0xff]   ;;  %200 = vmatprep.subr.bf16.mxu0 %v218_v2  ;;  %v221_v4 = vld [vmem:[#allocation5 + $0x14] ss:$8 sps:$4 sm:$0xff]   ;;  %v223_v5 = vld [vmem:[#allocation5 + $0x10] ss:$8 sps:$4 sm:$0xff]  }
  0x27   :  { %54 = vperm.xlu0 %217, %v51_v1   ;;  %202 = vmatpush1.bf16.msra.mxu0 %v220_v3  ;;  %v277_v6 = vmov 0.0   ;;  %v49_v7 = vld [vmem:[#allocation3] sm:$0xff]  ;;  %v50_v8 = vld [vmem:[#allocation3 + $0x8] sm:$0xff]  ;;  %vm59_vm0 = vcmask 261120   ;;  %vm104_vm1 = vcmask 1041409   ;;  %v93_v31 = vshrl.u32 %v92_v30, 7 }
  0x28   :  { %204 = vmatprep.subr.bf16.mxu0 %v221_v4  ;;  %172 = vmatprep.mubr.f32.mxu0 %v277_v6  ;;  %v90_v33 = vld [vmem:[%s351_s4] sm:$0x3] }
  0x29   :  { %v94_v32 = vsub.s32 0, %v93_v31  ;;  %v98_v34 = vsub.s32 1, %v93_v31 }
  0x2b   :  { %206 = vmatpush1.bf16.msra.mxu0 %v223_v5  ;;  %v95_v35 = vrot.slane %v90_v33, %v94_v32  ;;  %v99_v36 = vrot.slane %v90_v33, %v98_v34 }
  0xa6   :  { %v55_v9 = vpop.permute.xlu0 %54 }
  0xa7   :  { %v57_v10 = vmul.f32 %v55_v9, %v49_v7  ;;  %v58_v11 = vmul.f32 %v55_v9, %v50_v8 }
  0xa9   :  { %v60_v12 = vsel %vm59_vm0, %v57_v10, 0.0  ;;  %v67_v13 = vsel %vm59_vm0, %v58_v11, 0.0 }
  0xaa   :  { %v61_v14 = vrot.slane %v60_v12, 4  ;;  %v68_v15 = vrot.slane %v67_v13, 4 }
  0xac   :  { %v62_v16 = vadd.f32 %v61_v14, %v60_v12  ;;  %v69_v17 = vadd.f32 %v68_v15, %v67_v13 }
  0xae   :  { %v63_v18 = vrot.slane %v62_v16, 2  ;;  %v70_v19 = vrot.slane %v69_v17, 2 }
  0xb0   :  { %v64_v20 = vadd.f32 %v63_v18, %v62_v16  ;;  %v71_v21 = vadd.f32 %v70_v19, %v69_v17 }
  0xb2   :  { %v65_v22 = vrot.slane %v64_v20, 1  ;;  %v72_v23 = vrot.slane %v71_v21, 1 }
  0xb4   :  { %v66_v25 = vadd.f32 %v65_v22, %v64_v20  ;;  %v73_v26 = vadd.f32 %v72_v23, %v71_v21 }
  0xb6   :  { %v76_v27 = vadd.f32 %v75_v24, %v66_v25  ;;  %v77_v28 = vadd.f32 %v75_v24, %v73_v26 }
  0xb8   :  { %v105_v29 = vsel %vm104_vm1, %v77_v28, %v76_v27 }
  0xb9   :  { %197 = vmatmul.mubr.msk.f32.vlgmr.msra.gmra.mrb[0].mxu0 %vm59_vm0, %v105_v29 }
 0x18c   :  { %v174_v37 = vpop.f32.mrb[0].mxu0 }
 0x18d   :  { %v175_v38 = vadd.f32 %v174_v37, %v95_v35  ;;  %v176_v39 = vpop.f32.mrb[1].mxu0 }
 0x18e   :  { %v177_v40 = vadd.f32 %v176_v39, %v99_v36 }
 0x190   :  { %v181_v41 = vcombine.low %v175_v38, %v177_v40 }
 0x192   :  { %198 = vst.sshfl [vmem:[%s352_s5] sm:$0x33 pattern:$0x76325410] %v181_v41 }
 0x193   :  { %195 = vsyncpa [#allocation4], 1 }
 0x194   :  { %196 = vsyncpa [#allocation6], 1 }

</bundles_post_ra>
